<compile_context>
chip_gen: v6e
topology: v6e:2x2x1
jax: 0.10.0
libtpu: 0.0.40
codegen_flags: <defaults>
</compile_context>

<pallas_src>
import functools

import jax
import jax.numpy as jnp
from jax.experimental import pallas as pl
from jax.experimental.pallas import tpu as pltpu


def _round_up(x, n):
    return (x + n - 1) // n * n


def _vmem_tile_bytes(rows, cols, itemsize):
    """Conservative VMEM footprint of a (rows, cols) tile (vreg-tile padded)."""
    return _round_up(max(rows, 1), 8) * _round_up(max(cols, 1), 128) * itemsize


def _tpu_vmem_capacity_and_cores():
    """Generation-aware (VMEM bytes per core, TensorCores per chip)."""
    cap = 64 << 20          # conservative default (v7x per-TC VMEM)
    cores = 1
    try:
        info = pltpu.get_tpu_info()
        cap = int(getattr(info, "vmem_capacity_bytes", cap) or cap)
        for name in ("num_tensorcores", "tensorcores_per_chip",
                     "num_cores", "cores_per_chip"):
            v = getattr(info, name, None)
            if v:
                cores = max(1, min(int(v), 2))
                break
    except Exception:       # query unavailable -> safe defaults
        pass
    return cap, cores


def _footprint_bytes(block_m, block_mid, hidden, nl_p, x_isz, w_isz):
    """VMEM bytes for one grid step, counting Pallas's default 2x buffering."""
    fp = 2 * _vmem_tile_bytes(block_m, hidden, x_isz)        # x row tile
    fp += 2 * _vmem_tile_bytes(hidden, block_mid, w_isz)     # W1 K-slab
    fp += 2 * _vmem_tile_bytes(1, block_mid, 4)              # b1 slab (f32)
    fp += 2 * _vmem_tile_bytes(block_mid, nl_p, w_isz)       # W2 K-slab
    fp += 2 * _vmem_tile_bytes(1, nl_p, 4)                   # b2 (f32)
    fp += 2 * _vmem_tile_bytes(block_m, nl_p, x_isz)         # out tile
    fp += _vmem_tile_bytes(block_m, nl_p, 4)                 # f32 accumulator
    fp += _vmem_tile_bytes(block_m, block_mid, 4)            # live h intermediate
    fp += _vmem_tile_bytes(block_m, nl_p, 4)                 # live partial product
    return fp


def _pick_tiles(m, hidden, mid_p, nl_p, x_isz, w_isz, budget, num_cores):
    """Pick (block_m, block_mid) from an explicit VMEM budget.

    Prefers fully VMEM-resident W1/W2 (read once from HBM) as long as the row
    tile stays reasonably large; otherwise streams the weights in K-slabs of
    the mid dimension so block_m stays large (the kernel is HBM-bound on x).
    """
    m8 = _round_up(max(m, 1), 8)
    bm_candidates = [bm for bm in (2048, 1024, 512, 256, 128, 64, 32, 16, 8)
                     if bm <= m8] or [8]
    bmid_candidates = [mid_p] + [c for c in (2048, 1024, 512, 256, 128)
                                 if c < mid_p and mid_p % c == 0]

    def fits(bm, bmid):
        return _footprint_bytes(bm, bmid, hidden, nl_p, x_isz, w_isz) <= budget

    def split_for_cores(bm):
        # Only multi-TC parts (v7x) benefit from >= num_cores grid steps on
        # the "parallel" M axis; on 1-TC parts splitting just adds overhead.
        while num_cores > 1 and bm > 8 and pl.cdiv(m, bm) < num_cores:
            bm //= 2
        return bm

    # Pass 1: full mid residency (weights read once) with a decent row tile.
    for bm in bm_candidates:
        if bm >= min(m8, 256) and fits(bm, mid_p):
            return split_for_cores(bm), mid_p
    # Pass 2: largest row tile first, then the largest mid slab that fits.
    for bm in bm_candidates:
        for bmid in bmid_candidates:
            if fits(bm, bmid):
                return split_for_cores(bm), bmid
    return 8, 128  # fallback; only reachable with absurdly small budgets


def _mlp_head_kernel(x_ref, w1_ref, b1_ref, w2_ref, b2_ref, o_ref, acc_ref):
    # x_ref : (block_m, hidden)      streamed row tile (input dtype)
    # w1_ref: (hidden, block_mid)    classifier1 weight K-slab (compute dtype)
    # b1_ref: (1, block_mid)         classifier1 bias slab (f32)
    # w2_ref: (block_mid, nl_p)      classifier2 weight K-slab (compute dtype)
    # b2_ref: (1, nl_p)              classifier2 bias (f32)
    # o_ref : (block_m, nl_p)        output tile (resident across the k axis)
    # acc_ref: (block_m, nl_p) f32   accumulator over mid chunks
    k = pl.program_id(1)

    @pl.when(k == 0)
    def _init():
        acc_ref[...] = jnp.zeros_like(acc_ref)

    x = x_ref[...].astype(w1_ref.dtype)                       # bf16 MXU operands
    h = jnp.dot(x, w1_ref[...], preferred_element_type=jnp.float32)
    h = jnp.maximum(h + b1_ref[...], 0.0)                     # bias + ReLU in f32
    # Dropout (inference mode) == identity.
    acc_ref[...] += jnp.dot(h.astype(w2_ref.dtype), w2_ref[...],
                            preferred_element_type=jnp.float32)

    @pl.when(k == pl.num_programs(1) - 1)
    def _finalize():
        o_ref[...] = (acc_ref[...] + b2_ref[...]).astype(o_ref.dtype)


def prepare_params(w1, b1, w2, b2, compute_dtype=jnp.bfloat16):
    """One-time pad + cast of the head weights (hoisted out of the call path).

    Weights use [in, out] layout (transpose of PyTorch nn.Linear.weight).
    Zero-padding mid/num_label to 128-lane multiples is exact: padded hidden
    activations are relu(0 + 0) = 0 and padded W2 rows/columns are 0, and the
    padded output columns are sliced off after the kernel.
    """
    hidden, mid = w1.shape
    num_label = w2.shape[1]
    mid_p = _round_up(mid, 128)
    nl_p = _round_up(num_label, 128)
    w1_p = jnp.pad(w1.astype(compute_dtype), ((0, 0), (0, mid_p - mid)))
    b1_p = jnp.pad(b1.astype(jnp.float32), (0, mid_p - mid)).reshape(1, mid_p)
    w2_p = jnp.pad(w2.astype(compute_dtype),
                   ((0, mid_p - mid), (0, nl_p - num_label)))
    b2_p = jnp.pad(b2.astype(jnp.float32),
                   (0, nl_p - num_label)).reshape(1, nl_p)
    return w1_p, b1_p, w2_p, b2_p


@functools.partial(jax.jit,
                   static_argnames=("num_label", "block_m", "block_mid"))
def multi_nonlinear_classifier(x, w1_p, b1_p, w2_p, b2_p, *, num_label,
                               block_m=None, block_mid=None):
    """x: [..., hidden] -> [..., num_label], using prepare_params() weights."""
    hidden = x.shape[-1]
    mid_p = w1_p.shape[1]
    nl_p = w2_p.shape[1]
    assert w1_p.shape[0] == hidden and w2_p.shape[0] == mid_p
    assert mid_p % 128 == 0 and nl_p % 128 == 0

    lead = x.shape[:-1]
    m = 1
    for d in lead:
        m *= d
    x2d = x.reshape(m, hidden)

    x_isz = x.dtype.itemsize
    w_isz = w1_p.dtype.itemsize

    # Generation-aware budget/limit (v5e/v6e: 128 MiB VMEM; v7x: 64 MiB, 2 TCs).
    vmem_cap, num_cores = _tpu_vmem_capacity_and_cores()
    budget = int(vmem_cap * 0.75)

    if block_m is None or block_mid is None:
        bm, bmid = _pick_tiles(m, hidden, mid_p, nl_p,
                               x_isz, w_isz, budget, num_cores)
        block_m = block_m or bm
        block_mid = block_mid or bmid
    assert block_m % 8 == 0, "block_m must be a multiple of 8"
    assert mid_p % block_mid == 0, "block_mid must divide the padded mid dim"

    # No whole-x pad: ragged final row tile is handled by Pallas block clipping
    # (rows are independent, so garbage tail rows never hit in-bounds output).
    grid = (pl.cdiv(m, block_m), mid_p // block_mid)

    fp = _footprint_bytes(block_m, block_mid, hidden, nl_p, x_isz, w_isz)
    vmem_limit = int(max(min(fp + (8 << 20), int(vmem_cap * 0.9)), 16 << 20))

    out = pl.pallas_call(
        _mlp_head_kernel,
        out_shape=jax.ShapeDtypeStruct((m, nl_p), x.dtype),
        grid_spec=pltpu.PrefetchScalarGridSpec(
            num_scalar_prefetch=0,
            grid=grid,
            in_specs=[
                pl.BlockSpec((block_m, hidden), lambda i, k: (i, 0)),    # x tile
                pl.BlockSpec((hidden, block_mid), lambda i, k: (0, k)),  # W1 slab
                pl.BlockSpec((1, block_mid), lambda i, k: (0, k)),       # b1 slab
                pl.BlockSpec((block_mid, nl_p), lambda i, k: (k, 0)),    # W2 slab
                pl.BlockSpec((1, nl_p), lambda i, k: (0, 0)),            # b2
            ],
            out_specs=pl.BlockSpec((block_m, nl_p), lambda i, k: (i, 0)),
            scratch_shapes=[pltpu.VMEM((block_m, nl_p), jnp.float32)],
        ),
        compiler_params=pltpu.CompilerParams(
            dimension_semantics=("parallel", "arbitrary"),
            vmem_limit_bytes=vmem_limit),
    )(x2d, w1_p, b1_p, w2_p, b2_p)

    # TODO(synk): when the consumer can mask, return the padded (m, nl_p)
    # buffer (optionally bf16) to skip this extra slice/copy HBM pass.
    return out[:, :num_label].reshape(*lead, num_label)


def init_params(key, hidden_size, num_label, dtype=jnp.float32):
    """Deterministic init mimicking nn.Linear's uniform(-1/sqrt(fan_in), ...)."""
    mid = hidden_size // 2
    k1, k2, k3, k4 = jax.random.split(key, 4)
    bound1 = 1.0 / (hidden_size ** 0.5)
    bound2 = 1.0 / (mid ** 0.5)
    # store weights as [in, out] (transpose of PyTorch layout)
    w1 = jax.random.uniform(k1, (hidden_size, mid), dtype, -bound1, bound1)
    b1 = jax.random.uniform(k2, (mid,), dtype, -bound1, bound1)
    w2 = jax.random.uniform(k3, (mid, num_label), dtype, -bound2, bound2)
    b2 = jax.random.uniform(k4, (num_label,), dtype, -bound2, bound2)
    return w1, b1, w2, b2


if __name__ == "__main__":
    batch, seq, hidden_size, num_label = 2, 8, 32, 5
    dropout_rate = 0.1  # inference mode -> identity

    key = jax.random.PRNGKey(0)
    kx, kp = jax.random.split(key)
    x = jax.random.normal(kx, (batch, seq, hidden_size), dtype=jnp.float32)
    w1, b1, w2, b2 = init_params(kp, hidden_size, num_label)

    # One-time weight pad + bf16 cast (hoisted out of the per-call path).
    params = prepare_params(w1, b1, w2, b2)

    out = multi_nonlinear_classifier(x, *params, num_label=num_label)
    out = jax.block_until_ready(out)
    assert out.shape == (batch, seq, num_label)

    # Reference with identical bf16-operand / f32-accumulate numerics.
    cd = jnp.bfloat16
    h_ref = jnp.maximum(
        jnp.dot(x.astype(cd), w1.astype(cd),
                preferred_element_type=jnp.float32) + b1, 0.0)
    ref = jnp.dot(h_ref.astype(cd), w2.astype(cd),
                  preferred_element_type=jnp.float32) + b2
    assert jnp.allclose(out, ref, atol=1e-3, rtol=1e-3), "mismatch vs bf16 ref"

    # Sanity check against full-f32 math (looser: bf16 operand rounding).
    ref32 = jnp.maximum(x @ w1 + b1, 0.0) @ w2 + b2
    assert jnp.allclose(out, ref32, atol=5e-2, rtol=5e-2), "mismatch vs f32 ref"

    print("KERNEL_OK")
</pallas_src>

<mosaic_0001>
module attributes {stable_mosaic.version = 11 : i64} {
  func.func @_mlp_head_kernel(%arg0: i32, %arg1: i32, %arg2: memref<16x32xf32, #tpu.memory_space<vmem>>, %arg3: memref<32x128xbf16, #tpu.memory_space<vmem>>, %arg4: memref<1x128xf32, #tpu.memory_space<vmem>>, %arg5: memref<128x128xbf16, #tpu.memory_space<vmem>>, %arg6: memref<1x128xf32, #tpu.memory_space<vmem>>, %arg7: memref<16x128xf32, #tpu.memory_space<vmem>>, %arg8: memref<16x128xf32, #tpu.memory_space<vmem>>) attributes {dimension_semantics = [#tpu.dimension_semantics<parallel>, #tpu.dimension_semantics<arbitrary>], iteration_bounds = array<i64: 1, 1>, scalar_prefetch = 0 : i64, scratch_operands = 1 : i64, tpu.core_type = #tpu.core_type<tc>, window_params = [{transform_indices = @transform_0, window_bounds = array<i64: 16, 32>}, {transform_indices = @transform_1, window_bounds = array<i64: 32, 128>}, {transform_indices = @transform_2, window_bounds = array<i64: 1, 128>}, {transform_indices = @transform_3, window_bounds = array<i64: 128, 128>}, {pipeline_mode = #tpu.pipeline_mode<synchronous>, transform_indices = @transform_4, window_bounds = array<i64: 1, 128>}, {transform_indices = @transform_5, window_bounds = array<i64: 16, 128>}]} {
    %c0_i32 = arith.constant 0 : i32
    %0 = arith.cmpi eq, %arg1, %c0_i32 : i32
    %1 = arith.extui %0 : i1 to i32
    %c0_i32_0 = arith.constant 0 : i32
    %2 = arith.cmpi ne, %1, %c0_i32_0 : i32
    scf.if %2 {
      %cst_16 = arith.constant 0.000000e+00 : f32
      %21 = vector.broadcast %cst_16 : f32 to vector<16x128xf32>
      %c0_17 = arith.constant 0 : index
      %c0_18 = arith.constant 0 : index
      %22 = vector.load %arg8[%c0_17, %c0_18] : memref<16x128xf32, #tpu.memory_space<vmem>>, vector<16x128xf32>
      tpu.vector_store %arg8[%c0_17, %c0_18], %21 {strides = array<i32>} : memref<16x128xf32, #tpu.memory_space<vmem>>, vector<16x128xf32>,
    } else {
    }
    %c0 = arith.constant 0 : index
    %c0_1 = arith.constant 0 : index
    %3 = vector.load %arg2[%c0, %c0_1] : memref<16x32xf32, #tpu.memory_space<vmem>>, vector<16x32xf32>
    %4 = arith.truncf %3 : vector<16x32xf32> to vector<16x32xbf16>
    %c0_2 = arith.constant 0 : index
    %c0_3 = arith.constant 0 : index
    %5 = vector.load %arg3[%c0_2, %c0_3] : memref<32x128xbf16, #tpu.memory_space<vmem>>, vector<32x128xbf16>
    %cst = arith.constant dense<0.000000e+00> : vector<16x128xf32>
    %6 = tpu.matmul %4, %5, %cst {dimension_numbers = #tpu.dot_dimension_numbers<[1], [0], [0], [1], [0, 0, 1, 1], [], []>} : vector<16x32xbf16>, vector<32x128xbf16>, vector<16x128xf32> -> vector<16x128xf32>
    %c0_4 = arith.constant 0 : index
    %c0_5 = arith.constant 0 : index
    %7 = vector.load %arg4[%c0_4, %c0_5] : memref<1x128xf32, #tpu.memory_space<vmem>>, vector<1x128xf32>
    %8 = vector.broadcast %7 : vector<1x128xf32> to vector<16x128xf32>
    %9 = arith.addf %6, %8 : vector<16x128xf32>
    %cst_6 = arith.constant 0.000000e+00 : f32
    %10 = vector.broadcast %cst_6 : f32 to vector<16x128xf32>
    %11 = arith.maximumf %9, %10 : vector<16x128xf32>
    %c0_7 = arith.constant 0 : index
    %c0_8 = arith.constant 0 : index
    %12 = vector.load %arg8[%c0_7, %c0_8] : memref<16x128xf32, #tpu.memory_space<vmem>>, vector<16x128xf32>
    %13 = arith.truncf %11 : vector<16x128xf32> to vector<16x128xbf16>
    %c0_9 = arith.constant 0 : index
    %c0_10 = arith.constant 0 : index
    %14 = vector.load %arg5[%c0_9, %c0_10] : memref<128x128xbf16, #tpu.memory_space<vmem>>, vector<128x128xbf16>
    %cst_11 = arith.constant dense<0.000000e+00> : vector<16x128xf32>
    %15 = tpu.matmul %13, %14, %cst_11 {dimension_numbers = #tpu.dot_dimension_numbers<[1], [0], [0], [1], [0, 0, 1, 1], [], []>} : vector<16x128xbf16>, vector<128x128xbf16>, vector<16x128xf32> -> vector<16x128xf32>
    %16 = arith.addf %12, %15 : vector<16x128xf32>
    %c0_12 = arith.constant 0 : index
    %c0_13 = arith.constant 0 : index
    %17 = vector.load %arg8[%c0_12, %c0_13] : memref<16x128xf32, #tpu.memory_space<vmem>>, vector<16x128xf32>
    tpu.vector_store %arg8[%c0_12, %c0_13], %16 {strides = array<i32>} : memref<16x128xf32, #tpu.memory_space<vmem>>, vector<16x128xf32>,
    %c0_i32_14 = arith.constant 0 : i32
    %18 = arith.cmpi eq, %arg1, %c0_i32_14 : i32
    %19 = arith.extui %18 : i1 to i32
    %c0_i32_15 = arith.constant 0 : i32
    %20 = arith.cmpi ne, %19, %c0_i32_15 : i32
    scf.if %20 {
      %c0_16 = arith.constant 0 : index
      %c0_17 = arith.constant 0 : index
      %21 = vector.load %arg8[%c0_16, %c0_17] : memref<16x128xf32, #tpu.memory_space<vmem>>, vector<16x128xf32>
      %c0_18 = arith.constant 0 : index
      %c0_19 = arith.constant 0 : index
      %22 = vector.load %arg6[%c0_18, %c0_19] : memref<1x128xf32, #tpu.memory_space<vmem>>, vector<1x128xf32>
      %23 = vector.broadcast %22 : vector<1x128xf32> to vector<16x128xf32>
      %24 = arith.addf %21, %23 : vector<16x128xf32>
      %c0_20 = arith.constant 0 : index
      %c0_21 = arith.constant 0 : index
      %25 = vector.load %arg7[%c0_20, %c0_21] : memref<16x128xf32, #tpu.memory_space<vmem>>, vector<16x128xf32>
      tpu.vector_store %arg7[%c0_20, %c0_21], %24 {strides = array<i32>} : memref<16x128xf32, #tpu.memory_space<vmem>>, vector<16x128xf32>,
    } else {
    }
    return
  }
  func.func @transform_0(%arg0: i32, %arg1: i32) -> (i32, i32) {
    %c0_i32 = arith.constant 0 : i32
    %c0_i32_0 = arith.constant 0 : i32
    return %arg0, %c0_i32 : i32, i32
  }
  func.func @transform_1(%arg0: i32, %arg1: i32) -> (i32, i32) {
    %c0_i32 = arith.constant 0 : i32
    %c0_i32_0 = arith.constant 0 : i32
    return %c0_i32, %arg1 : i32, i32
  }
  func.func @transform_2(%arg0: i32, %arg1: i32) -> (i32, i32) {
    %c0_i32 = arith.constant 0 : i32
    %c0_i32_0 = arith.constant 0 : i32
    return %c0_i32, %arg1 : i32, i32
  }
  func.func @transform_3(%arg0: i32, %arg1: i32) -> (i32, i32) {
    %c0_i32 = arith.constant 0 : i32
    %c0_i32_0 = arith.constant 0 : i32
    return %arg1, %c0_i32 : i32, i32
  }
  func.func @transform_4(%arg0: i32, %arg1: i32) -> (i32, i32) {
    %c0_i32 = arith.constant 0 : i32
    %c0_i32_0 = arith.constant 0 : i32
    %c0_i32_1 = arith.constant 0 : i32
    return %c0_i32, %c0_i32_0 : i32, i32
  }
  func.func @transform_5(%arg0: i32, %arg1: i32) -> (i32, i32) {
    %c0_i32 = arith.constant 0 : i32
    %c0_i32_0 = arith.constant 0 : i32
    return %arg0, %c0_i32 : i32, i32
  }
}

</mosaic_0001>

<bundles_post_ra>
// kernel: multi_nonlinear_classifier.1
= control target key start
LH: loop header
LB: loop body
LE: loop exit
PB: predicated region body
PF: predicated region fallthrough
CT: control target
= control target key end

     0   :  { %10 = vsyncpa [#allocation4], 0  ;;  %s471_s0 = inlined_call_operand.hbm [shape: f32[16,32], index: 0, kind: input, shape index: {}]   ;;  %s472_s1 = inlined_call_operand.hbm [shape: bf16[32,128], index: 1, kind: input, shape index: {}]   ;;  %s473_s2 = inlined_call_operand.vmem [shape: f32[1,128], index: 2, kind: input, shape index: {}]   ;;  %s474_s3 = inlined_call_operand.hbm [shape: bf16[128,128], index: 3, kind: input, shape index: {}]   ;;  %s475_s4 = inlined_call_operand.vmem [shape: f32[1,128], index: 4, kind: input, shape index: {}]   ;;  %s476_s5 = inlined_call_operand.vmem [shape: f32[16,128], index: 5, kind: output, shape index: {}]  }
   0x1   :  { %11 = vsyncpa [#allocation6], 0  ;;  %s411_s18 = smov [#allocation5]  }
   0x2   :  { %s29_s19 = sshll.u32 %s411_s18, 4  ;;  %s30_s19 = int_to_ptr.vmem [resolvable:$true] %s29_s19 }
   0x3   :  { %s355_s20 = scalar_lea.vmem %s30_s19, 256  ;;  %p360_p1 = scmp.lt.s32.totalorder %s30_s19, %s30_s19 }
   0x4   :  { %p356_p0 = scmp.ne.s32.totalorder %s30_s19, %s355_s20  ;;  %p361_p2 = scmp.lt.s32.totalorder %s355_s20, %s355_s20 }
   0x6   :  { %p362_p3 = por %p361_p2, %p360_p1 }
   0x8   :  { %p363_p4 = pnand %p362_p3, %p356_p0 }
   0xa   :  { %366 = shalt.err (!%p363_p4)
}
   0xb   :  { %s412_s21 = smov 64   ;;  %s413_s22 = smov 4  }
   0xc   :  { %35 = dma.hbm_to_vmem [thread:$0]  %s472_s1, 256, %s30_s19, [#allocation6], %s412_s21, %s412_s21, %s413_s22  }
   0xd   :  { %s414_s25 = smov [#allocation3]  }
   0xe   :  { %s17_s26 = sshll.u32 %s414_s25, 4  ;;  %s18_s26 = int_to_ptr.vmem [resolvable:$true] %s17_s26 }
   0xf   :  { %s375_s27 = scalar_lea.vmem %s18_s26, 256  ;;  %p380_p6 = scmp.lt.s32.totalorder %s18_s26, %s18_s26 }
  0x10   :  { %p376_p5 = scmp.ne.s32.totalorder %s18_s26, %s375_s27  ;;  %p381_p7 = scmp.lt.s32.totalorder %s375_s27, %s375_s27 }
  0x12   :  { %p382_p8 = por %p381_p7, %p380_p6 }
  0x14   :  { %p383_p9 = pnand %p382_p8, %p376_p5 }
  0x16   :  { %386 = shalt.err (!%p383_p9)
}
  0x17   :  { %s415_s28 = smov 128   ;;  %s416_s29 = smov 8  }
  0x18   :  { %23 = dma.hbm_to_vmem [thread:$0]  %s471_s0, 256, %s18_s26, [#allocation4], %s415_s28, %s415_s28, %s416_s29  }
  0x19   :  { %s417_s7 = smov [#allocation7]  }
  0x1a   :  { %s43_s8 = sshll.u32 %s417_s7, 4  ;;  %s44_s8 = int_to_ptr.vmem [resolvable:$true] %s43_s8 }
  0x1b   :  { %s395_s1 = scalar_lea.vmem %s44_s8, 1024  ;;  %p400_p11 = scmp.lt.s32.totalorder %s44_s8, %s44_s8 }
  0x1c   :  { %p396_p10 = scmp.ne.s32.totalorder %s44_s8, %s395_s1  ;;  %p401_p12 = scmp.lt.s32.totalorder %s395_s1, %s395_s1 }
  0x1e   :  { %p402_p13 = por %p401_p12, %p400_p11 }
  0x20   :  { %p403_p0 = pnand %p402_p13, %p396_p10 }
  0x22   :  { %406 = shalt.err (!%p403_p0)
}
  0x23   :  { %49 = dma.hbm_to_vmem [thread:$0]  %s474_s3, 1024, %s44_s8, [#allocation6], %s412_s21, %s412_s21, %s413_s22  }
  0x24   :  { %407 = dma.done.wait [#allocation4], 256  }
  0x25   :  { %408 = vsyncadd [#allocation4], 4294967040 }
  0x26   :  { %409 = dma.done.wait [#allocation6], 1280  }
  0x27   :  { %410 = vsyncadd [#allocation6], 4294966016  ;;  %v418_v0 = vmov 0.0   ;;  %vm419_vm0 = vmmov 0   ;;  %v337_v1 = vld [vmem:[#allocation5 + $0x8] sm:$0xff]   ;;  %v338_v2 = vld [vmem:[#allocation5] sm:$0xff]  }
  0x28   :  { %300 = vmatprep.subr.bf16.mxu0 %v418_v0  ;;  %304 = vmatprep.mubr.msk.bf16.mxu0 %vm419_vm0, %v418_v0  ;;  %v68_v3 = vld [vmem:[#allocation3] sm:$0xff]  ;;  %v69_v4 = vld [vmem:[#allocation3 + $0x8] sm:$0xff]  ;;  %v339_v5 = vld [vmem:[#allocation7 + $0x38] sm:$0xff]   ;;  %vm94_vm1 = vcmask 261120  }
  0x29   :  { %308 = vmatprep.subr.bf16.mxu1 %v418_v0  ;;  %324 = vmatprep.mubr.msk.bf16.mxu1 %vm419_vm0, %v418_v0  ;;  %v70_v6 = vpack.c.bf16 %v69_v4, %v68_v3  ;;  %v340_v7 = vld [vmem:[#allocation7 + $0x30] sm:$0xff]   ;;  %v341_v8 = vld [vmem:[#allocation7 + $0x28] sm:$0xff]   ;;  %v342_v9 = vld [vmem:[#allocation7 + $0x20] sm:$0xff]  }
  0x2a   :  { %301 = vmatpush3.bf16.msra.mxu0 %v337_v1  ;;  %309 = vmatpush3.bf16.msra.mxu1 %v339_v5  ;;  %v343_v10 = vld [vmem:[#allocation7 + $0x18] sm:$0xff]   ;;  %v344_v11 = vld [vmem:[#allocation7 + $0x10] sm:$0xff]   ;;  %v345_v12 = vld [vmem:[#allocation7 + $0x8] sm:$0xff]  }
  0x2b   :  { %302 = vmatprep.subr.bf16.mxu0 %v418_v0  ;;  %310 = vmatprep.subr.bf16.mxu1 %v418_v0  ;;  %v346_v13 = vld [vmem:[#allocation7] sm:$0xff]  }
  0x2c   :  { %v275_v14 = vld [vmem:[%s473_s2] ss:$0 sm:$0xff] }
  0x2d   :  { %v287_v24 = vld [vmem:[%s475_s4] ss:$0 sm:$0xff] }
  0x2e   :  { %303 = vmatpush3.bf16.msra.mxu0 %v338_v2  ;;  %311 = vmatpush3.bf16.msra.mxu1 %v340_v7 }
  0x2f   :  { %312 = vmatprep.subr.bf16.mxu1 %v418_v0 }
  0x31   :  { %305 = vmatmul.mubr.msk.bf16.vlgmr.msra.gmra.mxu0 %vm94_vm1, %v70_v6 }
  0x32   :  { %313 = vmatpush3.bf16.msra.mxu1 %v341_v8 }
  0x33   :  { %314 = vmatprep.subr.bf16.mxu1 %v418_v0 }
  0x36   :  { %315 = vmatpush3.bf16.msra.mxu1 %v342_v9 }
  0x37   :  { %316 = vmatprep.subr.bf16.mxu1 %v418_v0 }
  0x3a   :  { %317 = vmatpush3.bf16.msra.mxu1 %v343_v10 }
  0x3b   :  { %318 = vmatprep.subr.bf16.mxu1 %v418_v0 }
  0x3e   :  { %319 = vmatpush3.bf16.msra.mxu1 %v344_v11 }
  0x3f   :  { %320 = vmatprep.subr.bf16.mxu1 %v418_v0 }
  0x42   :  { %321 = vmatpush3.bf16.msra.mxu1 %v345_v12 }
  0x43   :  { %322 = vmatprep.subr.bf16.mxu1 %v418_v0 }
  0x46   :  { %323 = vmatpush3.bf16.msra.mxu1 %v346_v13 }
  0xf1   :  { %v132_v15 = vpop.f32.mrf.mxu0 }
  0xf2   :  { %v133_v17 = vadd.f32 %v275_v14, %v132_v15 }
  0xf3   :  { %v306_v16 = vpop.f32.mrf.mxu0 }
  0xf4   :  { %v139_v21 = vmax.f32 %v133_v17, 0.0 }
  0xf5   :  { %v135_v18 = vpop.f32.mrf.mxu0 }
  0xf6   :  { %v136_v19 = vadd.f32 %v275_v14, %v135_v18 }
  0xf7   :  { %v307_v20 = vpop.f32.mrf.mxu0 }
  0xf8   :  { %v140_v22 = vmax.f32 %v136_v19, 0.0 }
  0xfa   :  { %v143_v23 = vpack.c.bf16 %v140_v22, %v139_v21 }
  0xfc   :  { %325 = vmatmul.mubr.bf16.vlgmr.msra.gmra.mxu1 %v143_v23 }
 0x1bc   :  { %v242_v25 = vpop.f32.mrf.mxu1 }
 0x1bd   :  { %v265_v26 = vadd.f32 %v287_v24, %v242_v25 }
 0x1be   :  { %v326_v27 = vpop.f32.mrf.mxu1 }
 0x1bf   :  { %267 = vst [vmem:[%s476_s5] sm:$0xff] %v265_v26 }
 0x1c0   :  { %v245_v28 = vpop.f32.mrf.mxu1 }
 0x1c1   :  { %v266_v29 = vadd.f32 %v287_v24, %v245_v28 }
 0x1c2   :  { %v327_v30 = vpop.f32.mrf.mxu1 }
 0x1c3   :  { %268 = vst [vmem:[%s476_s5 + $0x8] sm:$0xff] %v266_v29 }
 0x1c4   :  { %273 = vsyncpa [#allocation4], 1 }
 0x1c5   :  { %274 = vsyncpa [#allocation6], 1 }

</bundles_post_ra>
